<compile_context>
chip_gen: v6e
topology: v6e:2x2x1
jax: 0.10.0
libtpu: 0.0.40
codegen_flags: <defaults>
</compile_context>

<pallas_src>
import functools

import jax
import jax.numpy as jnp
import numpy as np
from jax.experimental import pallas as pl
from jax.experimental.pallas import tpu as pltpu


# ---------------------------------------------------------------------------
# Kernel A: global avg / max pooling over H*W, straight from r and d
# (NCHW flattened to (B, C, H*W)).  No concat: each half is reduced separately
# and written into its half of the (C2, 1) outputs.
# ---------------------------------------------------------------------------
def _pool_kernel(r_ref, d_ref, avg_ref, max_ref):
    C = r_ref.shape[1]
    r = r_ref[0].astype(jnp.float32)                      # (C, HW)
    d = d_ref[0].astype(jnp.float32)                      # (C, HW)
    avg_ref[0, :C] = jnp.mean(r, axis=1, keepdims=True)
    avg_ref[0, C:] = jnp.mean(d, axis=1, keepdims=True)
    max_ref[0, :C] = jnp.max(r, axis=1, keepdims=True)
    max_ref[0, C:] = jnp.max(d, axis=1, keepdims=True)


def pool_avg_max(r2, d2):
    B, C, HW = r2.shape
    C2 = 2 * C
    isz = r2.dtype.itemsize
    cost = pl.CostEstimate(flops=2 * B * C2 * HW,
                           transcendentals=0,
                           bytes_accessed=B * (2 * C * HW * isz + 2 * C2 * 4))
    avg, mx = pl.pallas_call(
        _pool_kernel,
        out_shape=(jax.ShapeDtypeStruct((B, C2, 1), jnp.float32),
                   jax.ShapeDtypeStruct((B, C2, 1), jnp.float32)),
        grid=(B,),
        in_specs=[pl.BlockSpec((1, C, HW), lambda b: (b, 0, 0)),
                  pl.BlockSpec((1, C, HW), lambda b: (b, 0, 0))],
        out_specs=(pl.BlockSpec((1, C2, 1), lambda b: (b, 0, 0)),
                   pl.BlockSpec((1, C2, 1), lambda b: (b, 0, 0))),
        compiler_params=pltpu.CompilerParams(
            dimension_semantics=("parallel",),
            vmem_limit_bytes=32 * 1024 * 1024),
        cost_estimate=cost,
    )(r2, d2)
    return avg[:, :, 0], mx[:, :, 0]                      # (B, C2) each


# ---------------------------------------------------------------------------
# Kernel B helpers + kernel: depthwise 3x3 (BN1 folded) + ReLU per half,
# pointwise 1x1 (BN2 folded) + ReLU split across the halves, gated combine.
# ---------------------------------------------------------------------------
def _dw3x3_relu(x, dw, H, W, xc, yc):
    """Depthwise 3x3 conv + bias + ReLU on a (C, HW) slab.

    dw: (C, 10) -- columns 0..8 are the 9 taps (BN1 scale folded, ordered
    (dy, dx) row-major as in the reference), column 9 is the BN1 shift.
    xc / yc: (1, HW) int32 column / row coordinates of each lane.
    Taps are lane rotations (pltpu.roll); row-wrap is killed with 2 pre-masked
    source variants (dx = +/-1) and 2 destination-row masks (dy = +/-1).
    """
    HW = x.shape[1]
    f32 = x.dtype
    # Sources usable by a dx = -1 tap must not sit in the last column (their
    # destination would wrap into the previous row); dx = +1 dually.
    x_for_m1 = x * (xc != W - 1).astype(f32)
    x_for_p1 = x * (xc != 0).astype(f32)
    src = {-1: x_for_m1, 0: x, 1: x_for_p1}
    row_ok = {-1: (yc != 0).astype(f32),       # dy = -1 taps invalid on row 0
              1: (yc != H - 1).astype(f32)}    # dy = +1 taps invalid on last row

    acc = None
    t = 0
    for oy in (-1, 0, 1):
        grp = None
        for ox in (-1, 0, 1):
            off = oy * W + ox                  # flat neighbour offset
            s = src[ox]
            if off != 0:
                s = pltpu.roll(s, shift=(-off) % HW, axis=1)   # s[p] = x[p+off]
            term = s * dw[:, t:t + 1]          # (C, HW) * (C, 1)
            grp = term if grp is None else grp + term
            t += 1
        if oy != 0:
            grp = grp * row_ok[oy]             # one mask mul per dy group
        acc = grp if acc is None else acc + grp
    return jnp.maximum(acc + dw[:, 9:10], 0.0)


def _main_kernel(r_ref, d_ref, dw_ref, pw_ref, b2_ref, gate_ref, out_ref,
                 *, H, W, mxu_dtype):
    HW = r_ref.shape[2]
    lane = jax.lax.broadcasted_iota(jnp.int32, (1, HW), 1)
    xc = lane % W
    yc = lane // W

    r = r_ref[0].astype(jnp.float32)                       # (C, HW)
    d = d_ref[0].astype(jnp.float32)                       # (C, HW)

    # Depthwise 3x3 + BN1 + ReLU, each half separately (no concat copy).
    h_r = _dw3x3_relu(r, dw_ref[0], H, W, xc, yc)          # (C, HW)
    h_d = _dw3x3_relu(d, dw_ref[1], H, W, xc, yc)          # (C, HW)

    # 1x1 pointwise conv (BN2 scale folded), split across the halves so the
    # channel concat never materializes.  bf16 MXU operands, f32 accumulation.
    y = (jnp.dot(pw_ref[0].astype(mxu_dtype), h_r.astype(mxu_dtype),
                 preferred_element_type=jnp.float32)
         + jnp.dot(pw_ref[1].astype(mxu_dtype), h_d.astype(mxu_dtype),
                   preferred_element_type=jnp.float32))    # (Cout, HW)
    y = jnp.maximum(y + b2_ref[...], 0.0)

    # Gated combine: cat1*mask1 + cat1 + cat1*mask2 == y * gate; dense store.
    out_ref[0] = (y * gate_ref[0]).astype(out_ref.dtype)


def main_path(r2, d2, dw, pw, b2, gate, H, W, mxu_dtype):
    B, C, HW = r2.shape
    C2 = 2 * C
    Cout = pw.shape[1]
    isz = r2.dtype.itemsize
    flops = B * HW * (18 * C2 + 2 * Cout * C2 + 8 * C2 + 3 * Cout)
    bytes_accessed = (B * (2 * C * HW * isz + Cout * HW * 4 + Cout * 4)
                      + (2 * C * 10 + 2 * Cout * C + Cout) * 4)
    cost = pl.CostEstimate(flops=flops, transcendentals=0,
                           bytes_accessed=bytes_accessed)
    kern = functools.partial(_main_kernel, H=H, W=W, mxu_dtype=mxu_dtype)
    return pl.pallas_call(
        kern,
        out_shape=jax.ShapeDtypeStruct((B, Cout, HW), jnp.float32),
        grid=(B,),
        in_specs=[
            pl.BlockSpec((1, C, HW), lambda b: (b, 0, 0)),     # r (flat NCHW)
            pl.BlockSpec((1, C, HW), lambda b: (b, 0, 0)),     # d
            pl.BlockSpec((2, C, 10), lambda b: (0, 0, 0)),     # dw taps + bn1 shift
            pl.BlockSpec((2, Cout, C), lambda b: (0, 0, 0)),   # pw weights^T * bn2 scale
            pl.BlockSpec((Cout, 1), lambda b: (0, 0)),         # bn2 shift
            pl.BlockSpec((1, Cout, 1), lambda b: (b, 0, 0)),   # gate = 1+mask1+mask2
        ],
        out_specs=pl.BlockSpec((1, Cout, HW), lambda b: (b, 0, 0)),
        compiler_params=pltpu.CompilerParams(
            dimension_semantics=("parallel",),
            vmem_limit_bytes=64 * 1024 * 1024),
        cost_estimate=cost,
    )(r2, d2, dw, pw, b2, gate)


# ---------------------------------------------------------------------------
# Parameters (deterministic, synthetic; BatchNorm folded for inference).
# ---------------------------------------------------------------------------
def _folded_bn(key, c):
    k1, k2, k3, k4 = jax.random.split(key, 4)
    gamma = 1.0 + 0.1 * jax.random.normal(k1, (c,), jnp.float32)
    beta = 0.1 * jax.random.normal(k2, (c,), jnp.float32)
    mean = 0.1 * jax.random.normal(k3, (c,), jnp.float32)
    var = 1.0 + 0.1 * jax.random.uniform(k4, (c,), jnp.float32)
    scale = gamma / jnp.sqrt(var + 1e-5)
    shift = beta - mean * scale
    return scale, shift


def init_params(dim, key):
    C = dim
    C2 = 2 * dim
    Ch = (2 * dim) // 4          # == dim // 2
    ks = jax.random.split(key, 16)
    p = {}
    # global_att: 1x1 conv (bias=True) + BN + GELU
    p["Wg"] = 0.2 * jax.random.normal(ks[0], (Ch, C2), jnp.float32)
    p["bg"] = 0.1 * jax.random.normal(ks[1], (Ch,), jnp.float32)
    p["g_scale"], p["g_shift"] = _folded_bn(ks[2], Ch)
    # local_att: 1x1 conv (bias=True) + BN + GELU
    p["Wl"] = 0.2 * jax.random.normal(ks[3], (Ch, C2), jnp.float32)
    p["bl"] = 0.1 * jax.random.normal(ks[4], (Ch,), jnp.float32)
    p["l_scale"], p["l_shift"] = _folded_bn(ks[5], Ch)
    # conv1 = DSConv3x3(dim//2 -> dim) at 1x1 spatial: only the centre tap.
    p["c1_dw_center"] = 0.3 * jax.random.normal(ks[6], (Ch,), jnp.float32)
    p["c1_s_a"], p["c1_b_a"] = _folded_bn(ks[7], Ch)
    p["c1_pw"] = 0.3 * jax.random.normal(ks[8], (Ch, C), jnp.float32)
    p["c1_s_b"], p["c1_b_b"] = _folded_bn(ks[9], C)
    # conv = DSConv3x3(dim*2 -> dim) on the full feature map.
    p["wdw"] = 0.3 * jax.random.normal(ks[10], (3, 3, C2), jnp.float32)
    p["s_a"], p["b_a"] = _folded_bn(ks[11], C2)
    p["wpw"] = 0.2 * jax.random.normal(ks[12], (C2, C), jnp.float32)
    p["s_b"], p["b_b"] = _folded_bn(ks[13], C)
    return p


# ---------------------------------------------------------------------------
# Glue: attention branch (tiny, O(B*dim)) kept in plain JAX (exact GELU/erf).
# ---------------------------------------------------------------------------
def _att_mask(avgp, maxp, p):
    local = jax.nn.gelu(
        p["l_scale"] * (maxp @ p["Wl"].T + p["bl"]) + p["l_shift"],
        approximate=False)
    glob = jax.nn.gelu(
        p["g_scale"] * (avgp @ p["Wg"].T + p["bg"]) + p["g_shift"],
        approximate=False)
    att = local + glob                                           # (B, Ch)
    h = jnp.maximum(p["c1_s_a"] * (att * p["c1_dw_center"]) + p["c1_b_a"], 0.0)
    y = jnp.maximum(p["c1_s_b"] * (h @ p["c1_pw"]) + p["c1_b_b"], 0.0)
    return jax.nn.sigmoid(y)                                     # (B, C)


def rdsm_forward(r, d, p, *, input_dtype=jnp.bfloat16, mxu_dtype=jnp.bfloat16):
    """r, d: NCHW (B, dim, H, W) float32. Returns NCHW (B, dim, H, W) f32.

    input_dtype: HBM staging dtype for the feature maps (bf16 halves the
    memory-bound bytes; both kernels upcast to f32 for VALU math).
    mxu_dtype: operand dtype of the 1x1 pointwise matmul (f32 accumulation).
    """
    B, C, H, W = r.shape
    C2 = 2 * C
    HW = H * W

    # NCHW -> (B, C, H*W): contiguous reshape; bf16 staging per perf review.
    r2 = r.reshape(B, C, HW).astype(input_dtype)
    d2 = d.reshape(B, C, HW).astype(input_dtype)

    # Pallas kernel A: spatial avg/max pooling straight from r, d.
    avgp, maxp = pool_avg_max(r2, d2)                            # (B, C2) each

    # channel_shuffle(cat, 4) commutes with global pooling -> permute vectors.
    cpg = C2 // 4
    perm = jnp.arange(C2).reshape(4, cpg).T.reshape(-1)

    mask1 = _att_mask(avgp, maxp, p)                             # (B, dim)
    mask2 = _att_mask(avgp[:, perm], maxp[:, perm], p)           # (B, dim)
    gate = (1.0 + mask1 + mask2).reshape(B, C, 1)

    # Fold BN scales into the conv weights; pack taps + bn1 shift per half.
    wdw_s = (p["wdw"] * p["s_a"]).reshape(9, C2)                 # (9, C2)
    dw_tab = jnp.concatenate([wdw_s.T, p["b_a"][:, None]], axis=1)   # (C2, 10)
    dw = jnp.stack([dw_tab[:C], dw_tab[C:]], axis=0)             # (2, C, 10)
    wpwt = (p["wpw"] * p["s_b"][None, :]).T                      # (Cout, C2)
    pw = jnp.stack([wpwt[:, :C], wpwt[:, C:]], axis=0)           # (2, Cout, C)
    b2 = p["b_b"].reshape(C, 1)

    # Pallas kernel B: DSConv3x3(2*dim -> dim) + gated combine, lane-dense.
    out = main_path(r2, d2, dw, pw, b2, gate, H, W, mxu_dtype)
    return out.reshape(B, C, H, W)                               # free bitcast


# ---------------------------------------------------------------------------
# Pure-JAX reference of the hot path (correctness check).
# ---------------------------------------------------------------------------
def _reference(r, d, p):
    cat = jnp.transpose(jnp.concatenate([r, d], axis=1), (0, 2, 3, 1))
    B, H, W, C2 = cat.shape
    avgp = jnp.mean(cat, axis=(1, 2))
    maxp = jnp.max(cat, axis=(1, 2))
    cpg = C2 // 4
    perm = jnp.arange(C2).reshape(4, cpg).T.reshape(-1)
    gate = 1.0 + _att_mask(avgp, maxp, p) + _att_mask(avgp[:, perm],
                                                      maxp[:, perm], p)
    xpad = jnp.pad(cat, ((0, 0), (1, 1), (1, 1), (0, 0)))
    acc = sum(xpad[:, dy:dy + H, dx:dx + W, :] * p["wdw"][dy, dx]
              for dy in range(3) for dx in range(3))
    h = jnp.maximum(acc * p["s_a"] + p["b_a"], 0.0)
    y = jnp.maximum(jnp.einsum("bhwc,cd->bhwd", h, p["wpw"]) * p["s_b"]
                    + p["b_b"], 0.0)
    out = y * gate[:, None, None, :]
    return jnp.transpose(out, (0, 3, 1, 2))


if __name__ == "__main__":
    B, dim, H, W = 2, 8, 16, 16
    key = jax.random.PRNGKey(0)
    kr, kd, kp = jax.random.split(key, 3)
    r = jax.random.normal(kr, (B, dim, H, W), jnp.float32)
    d = jax.random.normal(kd, (B, dim, H, W), jnp.float32)
    params = init_params(dim, kp)

    ref = jax.block_until_ready(_reference(r, d, params))

    # 1) All-f32 validation path: exact semantics check, tight tolerance.
    out_f32 = jax.block_until_ready(
        rdsm_forward(r, d, params, input_dtype=jnp.float32,
                     mxu_dtype=jnp.float32))
    assert out_f32.shape == (B, dim, H, W)
    np.testing.assert_allclose(np.asarray(out_f32), np.asarray(ref),
                               rtol=1e-4, atol=2e-4)

    # 2) Default perf path (bf16 HBM staging + bf16 MXU operands, f32 accum):
    #    tolerance loosened for the bf16 rounding, as the review recommends.
    out_bf16 = jax.block_until_ready(rdsm_forward(r, d, params))
    np.testing.assert_allclose(np.asarray(out_bf16), np.asarray(ref),
                               rtol=5e-2, atol=1e-1)

    print("KERNEL_OK")
</pallas_src>

<mosaic_0001>
module attributes {stable_mosaic.version = 11 : i64} {
  func.func @_pool_kernel(%arg0: i32, %arg1: memref<1x8x256xf32, #tpu.memory_space<vmem>>, %arg2: memref<1x8x256xf32, #tpu.memory_space<vmem>>, %arg3: memref<1x16x1xf32, #tpu.memory_space<vmem>>, %arg4: memref<1x16x1xf32, #tpu.memory_space<vmem>>) attributes {dimension_semantics = [#tpu.dimension_semantics<parallel>], iteration_bounds = array<i64: 2>, scalar_prefetch = 0 : i64, scratch_operands = 0 : i64, tpu.core_type = #tpu.core_type<tc>, window_params = [{transform_indices = @transform_0, window_bounds = array<i64: 1, 8, 256>}, {transform_indices = @transform_1, window_bounds = array<i64: 1, 8, 256>}, {transform_indices = @transform_2, window_bounds = array<i64: 1, 16, 1>}, {transform_indices = @transform_3, window_bounds = array<i64: 1, 16, 1>}]} {
    %c0 = arith.constant 0 : index
    %c0_0 = arith.constant 0 : index
    %c0_1 = arith.constant 0 : index
    %0 = vector.load %arg1[%c0, %c0_0, %c0_1] : memref<1x8x256xf32, #tpu.memory_space<vmem>>, vector<1x8x256xf32>
    %1 = vector.shape_cast %0 : vector<1x8x256xf32> to vector<8x256xf32>
    %c0_2 = arith.constant 0 : index
    %c0_3 = arith.constant 0 : index
    %c0_4 = arith.constant 0 : index
    %2 = vector.load %arg2[%c0_2, %c0_3, %c0_4] : memref<1x8x256xf32, #tpu.memory_space<vmem>>, vector<1x8x256xf32>
    %3 = vector.shape_cast %2 : vector<1x8x256xf32> to vector<8x256xf32>
    %cst = arith.constant dense<0.000000e+00> : vector<8xf32>
    %4 = vector.multi_reduction <add>, %1, %cst [1] : vector<8x256xf32> to vector<8xf32>
    %5 = vector.shape_cast %4 : vector<8xf32> to vector<8x1xf32>
    %cst_5 = arith.constant 2.560000e+02 : f32
    %6 = vector.broadcast %cst_5 : f32 to vector<8x1xf32>
    %7 = arith.divf %5, %6 : vector<8x1xf32>
    %c0_6 = arith.constant 0 : index
    %c0_7 = arith.constant 0 : index
    %c0_8 = arith.constant 0 : index
    %8 = vector.load %arg3[%c0_6, %c0_7, %c0_8] : memref<1x16x1xf32, #tpu.memory_space<vmem>>, vector<1x8x1xf32>
    %9 = vector.shape_cast %8 : vector<1x8x1xf32> to vector<8x1xf32>
    %10 = vector.shape_cast %7 : vector<8x1xf32> to vector<1x8x1xf32>
    tpu.vector_store %arg3[%c0_6, %c0_7, %c0_8], %10 {strides = array<i32>} : memref<1x16x1xf32, #tpu.memory_space<vmem>>, vector<1x8x1xf32>,
    %cst_9 = arith.constant dense<0.000000e+00> : vector<8xf32>
    %11 = vector.multi_reduction <add>, %3, %cst_9 [1] : vector<8x256xf32> to vector<8xf32>
    %12 = vector.shape_cast %11 : vector<8xf32> to vector<8x1xf32>
    %cst_10 = arith.constant 2.560000e+02 : f32
    %13 = vector.broadcast %cst_10 : f32 to vector<8x1xf32>
    %14 = arith.divf %12, %13 : vector<8x1xf32>
    %c0_11 = arith.constant 0 : index
    %c8 = arith.constant 8 : index
    %c0_12 = arith.constant 0 : index
    %15 = vector.load %arg3[%c0_11, %c8, %c0_12] : memref<1x16x1xf32, #tpu.memory_space<vmem>>, vector<1x8x1xf32>
    %16 = vector.shape_cast %15 : vector<1x8x1xf32> to vector<8x1xf32>
    %17 = vector.shape_cast %14 : vector<8x1xf32> to vector<1x8x1xf32>
    tpu.vector_store %arg3[%c0_11, %c8, %c0_12], %17 {strides = array<i32>} : memref<1x16x1xf32, #tpu.memory_space<vmem>>, vector<1x8x1xf32>,
    %cst_13 = arith.constant dense<0xFF800000> : vector<8xf32>
    %18 = vector.multi_reduction <maximumf>, %1, %cst_13 [1] : vector<8x256xf32> to vector<8xf32>
    %19 = vector.shape_cast %18 : vector<8xf32> to vector<8x1xf32>
    %c0_14 = arith.constant 0 : index
    %c0_15 = arith.constant 0 : index
    %c0_16 = arith.constant 0 : index
    %20 = vector.load %arg4[%c0_14, %c0_15, %c0_16] : memref<1x16x1xf32, #tpu.memory_space<vmem>>, vector<1x8x1xf32>
    %21 = vector.shape_cast %20 : vector<1x8x1xf32> to vector<8x1xf32>
    %22 = vector.shape_cast %19 : vector<8x1xf32> to vector<1x8x1xf32>
    tpu.vector_store %arg4[%c0_14, %c0_15, %c0_16], %22 {strides = array<i32>} : memref<1x16x1xf32, #tpu.memory_space<vmem>>, vector<1x8x1xf32>,
    %cst_17 = arith.constant dense<0xFF800000> : vector<8xf32>
    %23 = vector.multi_reduction <maximumf>, %3, %cst_17 [1] : vector<8x256xf32> to vector<8xf32>
    %24 = vector.shape_cast %23 : vector<8xf32> to vector<8x1xf32>
    %c0_18 = arith.constant 0 : index
    %c8_19 = arith.constant 8 : index
    %c0_20 = arith.constant 0 : index
    %25 = vector.load %arg4[%c0_18, %c8_19, %c0_20] : memref<1x16x1xf32, #tpu.memory_space<vmem>>, vector<1x8x1xf32>
    %26 = vector.shape_cast %25 : vector<1x8x1xf32> to vector<8x1xf32>
    %27 = vector.shape_cast %24 : vector<8x1xf32> to vector<1x8x1xf32>
    tpu.vector_store %arg4[%c0_18, %c8_19, %c0_20], %27 {strides = array<i32>} : memref<1x16x1xf32, #tpu.memory_space<vmem>>, vector<1x8x1xf32>,
    return
  }
  func.func @transform_0(%arg0: i32) -> (i32, i32, i32) {
    %c0_i32 = arith.constant 0 : i32
    %c0_i32_0 = arith.constant 0 : i32
    %c0_i32_1 = arith.constant 0 : i32
    return %arg0, %c0_i32, %c0_i32_0 : i32, i32, i32
  }
  func.func @transform_1(%arg0: i32) -> (i32, i32, i32) {
    %c0_i32 = arith.constant 0 : i32
    %c0_i32_0 = arith.constant 0 : i32
    %c0_i32_1 = arith.constant 0 : i32
    return %arg0, %c0_i32, %c0_i32_0 : i32, i32, i32
  }
  func.func @transform_2(%arg0: i32) -> (i32, i32, i32) {
    %c0_i32 = arith.constant 0 : i32
    %c0_i32_0 = arith.constant 0 : i32
    %c0_i32_1 = arith.constant 0 : i32
    return %arg0, %c0_i32, %c0_i32_0 : i32, i32, i32
  }
  func.func @transform_3(%arg0: i32) -> (i32, i32, i32) {
    %c0_i32 = arith.constant 0 : i32
    %c0_i32_0 = arith.constant 0 : i32
    %c0_i32_1 = arith.constant 0 : i32
    return %arg0, %c0_i32, %c0_i32_0 : i32, i32, i32
  }
}

</mosaic_0001>

<bundles_post_ra>
// kernel: tpu_custom_call.1
= control target key start
LH: loop header
LB: loop body
LE: loop exit
PB: predicated region body
PF: predicated region fallthrough
CT: control target
= control target key end

     0   :  { %9 = vsyncpa [#allocation3], 0  ;;  %s726_s0 = inlined_call_operand.hbm [shape: f32[2,8,256], index: 0, kind: input, shape index: {}]   ;;  %s727_s1 = inlined_call_operand.hbm [shape: f32[2,8,256], index: 1, kind: input, shape index: {}]   ;;  %s728_s2 = inlined_call_operand.vmem [shape: f32[2,16,1], index: 2, kind: output, shape index: {0}]   ;;  %s729_s3 = inlined_call_operand.vmem [shape: f32[2,16,1], index: 3, kind: output, shape index: {1}]  }
   0x1   :  { %11 = vsyncpa [#allocation3 + $0x1], 0 }
   0x2   :  { %12 = vsyncpa [#allocation5], 0 }
   0x3   :  { %14 = vsyncpa [#allocation5 + $0x1], 0  ;;  %s571_s12 = smov 0   ;;  %s573_s13 = smov 0  }
   0x4   :  { %s575_s14 = smov 0   ;;  %s577_s15 = smov 0  }
   0x5 LB: > { %s590_s16 = sadd.s32 4294967295, %s547_s15   ;;  %s593_s17 = sadd.s32 1, %s547_s15   ;;  %s547_s15 = sphi %s577_s15, %s741_s15   ;;  %s543_s14 = sphi %s575_s14, %s740_s14   ;;  %s539_s13 = sphi %s573_s13, %s739_s13   ;;  %s535_s12 = sphi %s571_s12, %s738_s12  }
   0x6   : > { %s24_s18 = ssub.s32 %s547_s15, %s593_s17  ;;  %s27_s19 = sadd.s32 1, %s543_s14 }
   0x7   : > { %p25_p0 = scmp.eq.s32.totalorder %s24_s18, 0  ;;  %p34_p1 = scmp.ne.s32.totalorder %s543_s14, %s539_s13 }
   0x8   : > { %p35_p2 = scmp.eq.s32.totalorder %s547_s15, 0  ;;  %p40_p3 = scmp.ne.s32.totalorder %s539_s13, %s535_s12 }
   0x9   : > { %s603_s20 = scalar_select %p25_p0, %s543_s14, %s27_s19  }
   0xa   : > { %p36_p4 = por %p35_p2, %p34_p1  ;;  %p41_p5 = scmp.eq.s32.totalorder %s590_s16, 0 }
   0xb   : > { %p420_p6 = scmp.lt.s32.totalorder %s547_s15, 2  ;;  %s612_s22 = sand.u32 1, %s543_s14  }
   0xc   : > { %p607_p7 = por %p41_p5, %p40_p3  ;;  %s390_s23 = sshll.u32 %s612_s22, 4 }
   0xd   : > { %s405_s24 = sshll.u32 %s547_s15, 8  ;;  %s146_s28 = scalar_lea.vmem [#allocation2], %s390_s23 }
   0xe   : > { %s731_s21 = scalar_select %p607_p7, 1, 0 }
   0xf   : > { %s621_s27 = scalar_lea.hbm %s726_s0, %s405_s24  ;;  %s154_s29 = sshll.u32 %s146_s28, 4  ;;  %s625_s29 = int_to_ptr.vmem [resolvable:$true] %s154_s29 }
  0x10   : > { %p627_p8 = pnand %p420_p6, %p36_p4  ;;  %s143_s4 = scalar_lea.sflag [#allocation3], %s612_s22 }
  0x11   : > { %s453_s5 = scalar_lea.hbm %s621_s27, 256  ;;  %s458_s8 = scalar_lea.hbm %s726_s0, 512 }
  0x12   : > { %p454_p11 = scmp.ne.s32.totalorder %s621_s27, %s453_s5  ;;  %p455_p12 = pneg %p627_p8 }
  0x13   : > { %p459_p1 = scmp.lt.s32.totalorder %s621_s27, %s726_s0  ;;  %p460_p2 = scmp.lt.s32.totalorder %s458_s8, %s453_s5 }
  0x14   : > { %p456_p13 = pnand %p455_p12, %p454_p11 }
  0x15   : > { %p461_p3 = por %p460_p2, %p459_p1 }
  0x16   : > { %p457_p0 = pneg %p456_p13 }
  0x18   : > { %p462_p4 = pnand %p461_p3, %p457_p0 }
  0x1a   : > { %465 = shalt.err (!%p462_p4)
}
  0x1b   : > { %s466_s11 = scalar_lea.vmem %s625_s29, 256  ;;  %s549_s12 = smov [#allocation2]  }
  0x1c   : > { %p467_p5 = scmp.ne.s32.totalorder %s625_s29, %s466_s11  ;;  %s471_s18 = sshll.u32 %s549_s12, 4  ;;  %s472_s18 = int_to_ptr.vmem [resolvable:$false] %s471_s18 }
  0x1d   : > { %s473_s19 = scalar_lea.vmem %s472_s18, 512  ;;  %p474_p13 = scmp.lt.s32.totalorder %s625_s29, %s472_s18 }
  0x1e   : > { %p469_p6 = pnand %p467_p5, %p455_p12  ;;  %p475_p9 = scmp.lt.s32.totalorder %s473_s19, %s466_s11 }
  0x20   : > { %p470_p11 = pneg %p469_p6  ;;  %p476_p10 = por %p475_p9, %p474_p13 }
  0x22   : > { %p477_p1 = pnand %p476_p10, %p470_p11 }
  0x24   : > { %480 = shalt.err (!%p477_p1)
}
  0x25   : > { %416 = dma.hbm_to_vmem [thread:$0]  (!%p627_p8), %s621_s27, 256, %s625_s29, %s143_s4  }
  0x26   : > { %p733_p0 = scmp.lt.s32.totalorder %s547_s15, 3  ;;  %p734_p2 = scmp.ge.s32.totalorder %s547_s15, 1 }
  0x27   : > { %s671_s5 = scalar_lea.hbm %s727_s1, %s405_s24  ;;  %s165_s6 = scalar_lea.vmem [#allocation4], %s390_s23 }
  0x28   : > { %p662_p3 = pnand %p734_p2, %p733_p0  ;;  %s173_s7 = sshll.u32 %s165_s6, 4  ;;  %s174_s7 = int_to_ptr.vmem [resolvable:$true] %s173_s7 }
  0x29   : > { %s162_s27 = scalar_lea.sflag [#allocation5], %s612_s22  ;;  %s481_s29 = scalar_lea.hbm %s671_s5, 256 }
  0x2a   : > { %s735_s25 = scalar_select %p662_p3, 1, 0 }
  0x2b   : > { %p482_p9 = scmp.ne.s32.totalorder %s671_s5, %s481_s29  ;;  %s486_s8 = scalar_lea.hbm %s727_s1, 512 }
  0x2c   : > { %p487_p5 = scmp.lt.s32.totalorder %s671_s5, %s727_s1  ;;  %p488_p6 = scmp.lt.s32.totalorder %s486_s8, %s481_s29 }
  0x2d   : > { %p484_p10 = pnand %p482_p9, %p455_p12 }
  0x2e   : > { %p489_p11 = por %p488_p6, %p487_p5 }
  0x2f   : > { %p485_p4 = pneg %p484_p10 }
  0x31   : > { %p490_p13 = pnand %p489_p11, %p485_p4 }
  0x33   : > { %493 = shalt.err (!%p490_p13)
}
  0x34   : > { %s494_s23 = scalar_lea.vmem %s174_s7, 256  ;;  %s550_s22 = smov [#allocation4]  }
  0x35   : > { %p495_p1 = scmp.ne.s32.totalorder %s174_s7, %s494_s23  ;;  %s499_s10 = sshll.u32 %s550_s22, 4  ;;  %s500_s10 = int_to_ptr.vmem [resolvable:$false] %s499_s10 }
  0x36   : > { %s501_s11 = scalar_lea.vmem %s500_s10, 512  ;;  %p502_p9 = scmp.lt.s32.totalorder %s174_s7, %s500_s10 }
  0x37   : > { %p497_p0 = pnand %p495_p1, %p455_p12  ;;  %p503_p10 = scmp.lt.s32.totalorder %s501_s11, %s494_s23 }
  0x39   : > { %p498_p2 = pneg %p497_p0  ;;  %p504_p7 = por %p503_p10, %p502_p9 }
  0x3b   : > { %p505_p3 = pnand %p504_p7, %p498_p2 }
  0x3d   : > { %508 = shalt.err (!%p505_p3)
}
  0x3e   : > { %419 = dma.hbm_to_vmem [thread:$0]  (!%p627_p8), %s671_s5, 256, %s174_s7, %s162_s27  }
  0x3f   : > { %p736_p4 = scmp.ne.s32.totalorder %s735_s25, 0 }
  0x40   : > { %s184_s12 = sand.u32 (!%p736_p4), 1, %s539_s13   ;;  %p737_p12 = scmp.ne.s32.totalorder (!%p736_p4), %s731_s21, 0 }
  0x41   : > { %182 = sbr.rel (%p736_p4) target bundleno = 221 (0xdd), region = 28  ;;  %s397_s18 = sshll.u32 (!%p736_p4), %s184_s12, 4 }
  0x42   : > { %s185_s19 = scalar_lea.sflag (!%p736_p4), [#allocation3], %s184_s12  ;;  %s188_s26 = scalar_lea.vmem (!%p736_p4), [#allocation2], %s397_s18 }
  0x46   : > { %526 = dma.done.wait (%p737_p12), %s185_s19, 256  }
  0x47   : > { %528 = vsyncadd (%p737_p12), %s185_s19, 4294967040  ;;  %s194_s28 = scalar_lea.sflag [#allocation5], %s184_s12  ;;  %s197_s6 = scalar_lea.vmem [#allocation4], %s397_s18 }
  0x48   : > { %530 = dma.done.wait (%p737_p12), %s194_s28, 256  }
  0x49   : > { %532 = vsyncadd (%p737_p12), %s194_s28, 4294967040  ;;  %v240_v0 = vld [vmem:[%s188_s26] sm:$0xff]  ;;  %v241_v1 = vld [vmem:[%s188_s26 + $0x8] sm:$0xff]  ;;  %p230_p7 = scmp.lt.s32.totalorder %s590_s16, 1  ;;  %vm249_vm0 = vcmask 7168  }
  0x4a   : > { %v242_v2 = vld [vmem:[%s197_s6] sm:$0xff]  ;;  %v244_v3 = vadd.f32 %v241_v1, %v240_v0  ;;  %v256_v4 = vmax.f32 %v240_v0, %v241_v1  ;;  %v243_v5 = vld [vmem:[%s197_s6 + $0x8] sm:$0xff] }
  0x4b   : > { %v251_v6 = vadd.f32 %v243_v5, %v242_v2  ;;  %v260_v7 = vmax.f32 %v242_v2, %v243_v5  ;;  %s743_s16 = smov (!%p230_p7, %s590_s16), 1 }
  0x4c   : > { %245 = vadd.xlane.f32.xlu0 %v244_v3  ;;  %257 = vmax.xlane.f32.xlu1 %v256_v4  ;;  %s407_s30 = sshll.u32 %s743_s16, 4 }
  0x4d   : > { %s239_s5 = scalar_lea.vmem %s729_s3, %s407_s30  ;;  %s234_s29 = scalar_lea.vmem %s728_s2, %s407_s30 }
  0x50   : > { %252 = vadd.xlane.f32.xlu0 %v251_v6  ;;  %261 = vmax.xlane.f32.xlu1 %v260_v7 }
  0xd5   : > { %v246_v8 = vpop.xlane.xlu0 %245  ;;  %v258_v9 = vpop.xlane.xlu1 %257 }
  0xd6   : > { %v248_v10 = vmul.f32 0.00390625, %v246_v8  ;;  %259 = vst.msk [vmem:[%s239_s5] sm:$0xff] %vm249_vm0, %v258_v9 }
  0xd8   : > { %250 = vst.msk [vmem:[%s234_s29] sm:$0xff] %vm249_vm0, %v248_v10 }
  0xd9   : > { %v253_v11 = vpop.xlane.xlu0 %252  ;;  %v262_v12 = vpop.xlane.xlu1 %261 }
  0xda   : > { %v254_v13 = vmul.f32 0.00390625, %v253_v11  ;;  %263 = vst.msk [vmem:[%s239_s5 + $0x8] sm:$0xff] %vm249_vm0, %v262_v12 }
  0xdc   : > { %255 = vst.msk [vmem:[%s234_s29 + $0x8] sm:$0xff] %vm249_vm0, %v254_v13 }
  0xdd PF: > { %p17_p8 = scmp.ge.s32.totalorder %s593_s17, 4   ;;  %s738_s12 = smov %s539_s13 }
  0xde   : > { %s739_s13 = smov %s543_s14  ;;  %s740_s14 = smov %s603_s20 }
  0xdf   : > { %s741_s15 = smov %s593_s17  ;;  %19 = sbr.rel (!%p17_p8) target bundleno = 5 (0x5), region = 93 }
  0xe4   :  { %301 = vsyncpa [#allocation3], 1 }
  0xe5   :  { %303 = vsyncpa [#allocation3 + $0x1], 1 }
  0xe6   :  { %304 = vsyncpa [#allocation5], 1 }
  0xe7   :  { %306 = vsyncpa [#allocation5 + $0x1], 1 }

</bundles_post_ra>
